<compile_context>
chip_gen: v7x
topology: tpu7x:2x2x1
jax: 0.10.0
libtpu: 0.0.40
codegen_flags: <defaults>
</compile_context>

<pallas_src>
import functools

import jax
import jax.numpy as jnp
from jax.experimental import pallas as pl
from jax.experimental.pallas import tpu as pltpu

LANE = 128   # TPU lane width (last dim)
TB = 16      # batch tile: multiple of 16 so bf16 activation vregs are packed


def _round_up(x, m):
    return ((x + m - 1) // m) * m


def _pad2d(a, rows, cols):
    out = jnp.zeros((rows, cols), a.dtype)
    return out.at[: a.shape[0], : a.shape[1]].set(a)


# ----------------------------------------------------------------------------
# Deterministic parameter construction (raw, unpadded f32 params)
# ----------------------------------------------------------------------------
def _make_linear_params(key, d_in, d_out):
    k_w, k_b = jax.random.split(key)
    scale = 1.0 / jnp.sqrt(jnp.float32(d_in))
    w = jax.random.normal(k_w, (d_in, d_out), jnp.float32) * scale
    b = jax.random.normal(k_b, (1, d_out), jnp.float32) * 0.01
    return {"w": w, "b": b}


# ----------------------------------------------------------------------------
# Fused Pallas kernel: entire MetaModel forward for one batch tile.
# Weights/biases are VMEM-resident across batch tiles (constant index maps).
# ----------------------------------------------------------------------------
def _meta_fused_kernel(
    x_img_ref, x_tab_ref,            # (TB, d_img_p) / (TB, d_tab_p) bf16
    w_img_ref, w_tab_ref,            # input-module weights, bf16
    w_c_img_ref, w_c_tab_ref,        # merged fusion||head-B weights, bf16
    w_a_ref,                         # head-A weights, bf16
    b_img_ref, b_tab_ref, b_c_ref, b_a_ref,   # (1, LANE) f32 biases
    out_a_ref, out_comb_ref,         # (TB, LANE) f32 outputs
):
    f32 = jnp.float32

    # --- input modules: relu(x @ W + b), bf16 operands, f32 MXU accumulation
    h_img = jnp.maximum(
        jnp.dot(x_img_ref[...], w_img_ref[...], preferred_element_type=f32)
        + b_img_ref[...],
        0.0,
    )
    h_tab = jnp.maximum(
        jnp.dot(x_tab_ref[...], w_tab_ref[...], preferred_element_type=f32)
        + b_tab_ref[...],
        0.0,
    )
    h_img_b = h_img.astype(jnp.bfloat16)
    h_tab_b = h_tab.astype(jnp.bfloat16)

    # --- merged "computed" fusion + head-B pre-activations in ONE dot per
    #     modality (concat replaced by split-weight dots; no copies):
    #       lanes [0, hid)         -> fusion pre-activation
    #       lanes [hid, hid+n_b)   -> head-B logits (pass-through fusion)
    comb = (
        jnp.dot(h_img_b, w_c_img_ref[...], preferred_element_type=f32)
        + jnp.dot(h_tab_b, w_c_tab_ref[...], preferred_element_type=f32)
        + b_c_ref[...]
    )
    out_comb_ref[...] = comb.astype(out_comb_ref.dtype)   # head-B read raw here

    # --- GELU on the whole slab is safe: w_a rows beyond `hid` are zero, so
    #     the head-B / padding lanes never reach head A.
    fused_b = jax.nn.gelu(comb).astype(jnp.bfloat16)

    # --- output head A <- "computed" fusion
    out_a_ref[...] = (
        jnp.dot(fused_b, w_a_ref[...], preferred_element_type=f32)
        + b_a_ref[...]
    ).astype(out_a_ref.dtype)


def _fused_meta_forward(packed, image, tabular, *, n_a, n_b, off_b):
    """Prep (flatten/pad/cast) + single batch-tiled pallas_call + un-pad."""
    B = image.shape[0]
    Bp = _round_up(B, TB)
    n_tiles = Bp // TB
    d_img_p = packed["w_img"].shape[0]
    d_tab_p = packed["w_tab"].shape[0]

    # NCHW -> [B, C*H*W]; only pad what is actually short (image features are
    # already lane-aligned at 1024, so this is a batch-axis-only pad for it).
    x_img = image.reshape(B, -1).astype(jnp.bfloat16)
    x_tab = tabular.astype(jnp.bfloat16)
    x_img_p = jnp.pad(x_img, ((0, Bp - B), (0, d_img_p - x_img.shape[1])))
    x_tab_p = jnp.pad(x_tab, ((0, Bp - B), (0, d_tab_p - x_tab.shape[1])))

    batch_map = lambda i: (i, 0)   # per-batch-tile blocks
    const_map = lambda i: (0, 0)   # VMEM-resident weights/biases

    grid_spec = pltpu.PrefetchScalarGridSpec(
        num_scalar_prefetch=0,
        grid=(n_tiles,),
        in_specs=[
            pl.BlockSpec((TB, d_img_p), batch_map),
            pl.BlockSpec((TB, d_tab_p), batch_map),
            pl.BlockSpec((d_img_p, LANE), const_map),
            pl.BlockSpec((d_tab_p, LANE), const_map),
            pl.BlockSpec((LANE, LANE), const_map),
            pl.BlockSpec((LANE, LANE), const_map),
            pl.BlockSpec((LANE, LANE), const_map),
            pl.BlockSpec((1, LANE), const_map),
            pl.BlockSpec((1, LANE), const_map),
            pl.BlockSpec((1, LANE), const_map),
            pl.BlockSpec((1, LANE), const_map),
        ],
        out_specs=(
            pl.BlockSpec((TB, LANE), batch_map),
            pl.BlockSpec((TB, LANE), batch_map),
        ),
    )

    out_a_p, out_comb_p = pl.pallas_call(
        _meta_fused_kernel,
        out_shape=(
            jax.ShapeDtypeStruct((Bp, LANE), jnp.float32),
            jax.ShapeDtypeStruct((Bp, LANE), jnp.float32),
        ),
        grid_spec=grid_spec,
        compiler_params=pltpu.CompilerParams(
            dimension_semantics=("parallel",)),   # v7x megacore splits batch tiles
    )(
        x_img_p, x_tab_p,
        packed["w_img"], packed["w_tab"],
        packed["w_c_img"], packed["w_c_tab"], packed["w_a"],
        packed["b_img"], packed["b_tab"], packed["b_c"], packed["b_a"],
    )
    # slice padding back out (pad rows/lanes never feed any reduction)
    return out_a_p[:B, :n_a], out_comb_p[:B, off_b:off_b + n_b]


# ----------------------------------------------------------------------------
# MetaModel equivalent (fused Pallas forward)
# ----------------------------------------------------------------------------
class MetaModel:
    def __init__(self, input_modules, fusion_modules, output_modules,
                 fusion_to_output_mapping, tensor_broker):
        self.input_modules = input_modules
        self.fusion_modules = fusion_modules
        self.output_modules = output_modules
        self.fusion_to_output_mapping = fusion_to_output_mapping
        # TODO(synk): tensor_broker hooks (intermediate tensor routing) are a
        # config-driven no-op here; empty dict means no broker connections.
        self.tensor_broker = tensor_broker

        # Concrete-instance assumptions for the fused kernel topology.
        assert sorted(input_modules) == ["image", "tabular"]
        assert fusion_to_output_mapping == {
            "output_a": "computed",
            "output_b": "pass-through",
        }

        img = input_modules["image"]["params"]
        tab = input_modules["tabular"]["params"]
        fus = fusion_modules["computed"]["params"]
        out_a = output_modules["output_a"]["params"]
        out_b = output_modules["output_b"]["params"]

        d_img, hid = img["w"].shape
        d_tab, hid2 = tab["w"].shape
        assert hid == hid2
        n_a = out_a["w"].shape[1]
        n_b = out_b["w"].shape[1]
        assert n_a <= LANE and hid + n_b <= LANE   # merged fusion||head-B fits in lanes

        d_img_p = _round_up(d_img, LANE)
        d_tab_p = _round_up(d_tab, LANE)
        off_b = hid   # head-B logit lanes start right after the fusion lanes

        def pw(w, rows, cols):   # zero-padded, bf16 MXU operand
            return _pad2d(w, rows, cols).astype(jnp.bfloat16)

        def pb(b):               # lane-dense (1, LANE) f32 bias (sublane-broadcast in kernel)
            return _pad2d(b.astype(jnp.float32), 1, LANE)

        # Fusion / pass-through concat order is sorted modality names:
        # ["image", "tabular"] -> split stacked weights into per-modality
        # halves; merge fusion + head-B columns into one matrix per modality.
        def merged(fus_half, head_b_half):
            m = jnp.zeros((LANE, LANE), jnp.float32)
            m = m.at[:hid, :hid].set(fus_half)
            m = m.at[:hid, off_b:off_b + n_b].set(head_b_half)
            return m.astype(jnp.bfloat16)

        b_c = jnp.zeros((1, LANE), jnp.float32)
        b_c = b_c.at[:, :hid].set(fus["b"].astype(jnp.float32))
        b_c = b_c.at[:, off_b:off_b + n_b].set(out_b["b"].astype(jnp.float32))

        self._packed = {
            "w_img": pw(img["w"], d_img_p, LANE),
            "w_tab": pw(tab["w"], d_tab_p, LANE),
            "w_c_img": merged(fus["w"][:hid], out_b["w"][:hid]),
            "w_c_tab": merged(fus["w"][hid:], out_b["w"][hid:]),
            "w_a": pw(out_a["w"], LANE, LANE),
            "b_img": pb(img["b"]),
            "b_tab": pb(tab["b"]),
            "b_c": b_c,
            "b_a": pb(out_a["b"]),
        }
        self._targets = {
            "output_a": output_modules["output_a"]["target"],
            "output_b": output_modules["output_b"]["target"],
        }
        self._forward = jax.jit(
            functools.partial(_fused_meta_forward, n_a=n_a, n_b=n_b, off_b=off_b)
        )

    def forward(self, inputs):
        logits_a, logits_b = self._forward(
            self._packed, inputs["image"], inputs["tabular"]
        )
        return {
            "output_a": {self._targets["output_a"]: logits_a},
            "output_b": {self._targets["output_b"]: logits_b},
        }

    __call__ = forward


# ----------------------------------------------------------------------------
# Pure-JAX reference composition (mirrors the original run_meta_forward)
# ----------------------------------------------------------------------------
def _make_ref_input_module(params, flatten):
    def forward(x):
        if flatten:
            x = x.reshape(x.shape[0], -1)
        y = jnp.dot(x.astype(jnp.bfloat16), params["w"].astype(jnp.bfloat16),
                    preferred_element_type=jnp.float32) + params["b"]
        return jnp.maximum(y, 0.0)
    return forward


def _make_ref_computed_fusion(params):
    def forward(features):
        x = jnp.concatenate([features[k] for k in sorted(features)], axis=-1)
        y = jnp.dot(x.astype(jnp.bfloat16), params["w"].astype(jnp.bfloat16),
                    preferred_element_type=jnp.float32) + params["b"]
        return jax.nn.gelu(y)   # NOTE: tanh-approx GELU in both kernel and ref
    return forward


def _make_ref_passthrough_fusion():
    def forward(features):
        return jnp.concatenate([features[k] for k in sorted(features)], axis=-1)
    return forward


def _make_ref_output_module(params, target_name):
    def forward(fused):
        y = jnp.dot(fused.astype(jnp.bfloat16), params["w"].astype(jnp.bfloat16),
                    preferred_element_type=jnp.float32) + params["b"]
        return {target_name: y}
    return forward


def run_meta_forward(input_modules, fusion_modules, output_modules,
                     fusion_to_output_mapping, inputs):
    feature_extractors_out = {
        name: module(inputs[name]) for name, module in input_modules.items()
    }
    fusion_out = {
        name: module(feature_extractors_out)
        for name, module in fusion_modules.items()
    }
    output_modules_out = {}
    for output_name, output_module in output_modules.items():
        fusion_key = fusion_to_output_mapping[output_name]
        output_modules_out[output_name] = output_module(fusion_out[fusion_key])
    return output_modules_out


# ----------------------------------------------------------------------------
# Build a small deterministic instance and run it
# ----------------------------------------------------------------------------
if __name__ == "__main__":
    key = jax.random.PRNGKey(0)
    (k_in_img, k_in_tab, k_fusion, k_out_a, k_out_b,
     k_x_img, k_x_tab) = jax.random.split(key, 7)

    B = 2
    C, H, W = 4, 16, 16           # image-like modality, NCHW
    F_TAB = 16                    # tabular modality features
    HID = 32                      # per-modality feature-extractor output dim
    N_CLASSES_A = 4
    N_CLASSES_B = 3

    img_params = _make_linear_params(k_in_img, C * H * W, HID)
    tab_params = _make_linear_params(k_in_tab, F_TAB, HID)
    fusion_params = _make_linear_params(k_fusion, 2 * HID, HID)
    out_a_params = _make_linear_params(k_out_a, HID, N_CLASSES_A)
    out_b_params = _make_linear_params(k_out_b, 2 * HID, N_CLASSES_B)

    input_modules = {
        "image": {"params": img_params, "flatten": True},
        "tabular": {"params": tab_params, "flatten": False},
    }
    fusion_modules = {
        "computed": {"params": fusion_params},
        "pass-through": {},
    }
    output_modules = {
        "output_a": {"params": out_a_params, "target": "target_a"},
        "output_b": {"params": out_b_params, "target": "target_b"},
    }
    fusion_to_output_mapping = {
        "output_a": "computed",
        "output_b": "pass-through",
    }

    model = MetaModel(
        input_modules=input_modules,
        fusion_modules=fusion_modules,
        output_modules=output_modules,
        fusion_to_output_mapping=fusion_to_output_mapping,
        tensor_broker={},
    )

    inputs = {
        "image": jax.random.normal(k_x_img, (B, C, H, W), jnp.float32),
        "tabular": jax.random.normal(k_x_tab, (B, F_TAB), jnp.float32),
    }

    out = model(inputs)
    out = jax.block_until_ready(out)

    # Reference: the original composition run with pure JAX modules.
    ref_inputs_mods = {
        "image": _make_ref_input_module(img_params, flatten=True),
        "tabular": _make_ref_input_module(tab_params, flatten=False),
    }
    ref_fusion_mods = {
        "computed": _make_ref_computed_fusion(fusion_params),
        "pass-through": _make_ref_passthrough_fusion(),
    }
    ref_output_mods = {
        "output_a": _make_ref_output_module(out_a_params, "target_a"),
        "output_b": _make_ref_output_module(out_b_params, "target_b"),
    }
    ref = run_meta_forward(ref_inputs_mods, ref_fusion_mods, ref_output_mods,
                           fusion_to_output_mapping, inputs)

    a = out["output_a"]["target_a"]
    b = out["output_b"]["target_b"]
    assert a.shape == (B, N_CLASSES_A)
    assert b.shape == (B, N_CLASSES_B)
    assert jnp.allclose(a, ref["output_a"]["target_a"], rtol=2e-2, atol=2e-2)
    assert jnp.allclose(b, ref["output_b"]["target_b"], rtol=2e-2, atol=2e-2)
    print("KERNEL_OK")
</pallas_src>

<mosaic_0001>
module attributes {stable_mosaic.version = 11 : i64} {
  func.func @_meta_fused_kernel(%arg0: i32, %arg1: memref<16x1024xbf16, #tpu.memory_space<vmem>>, %arg2: memref<16x128xbf16, #tpu.memory_space<vmem>>, %arg3: memref<1024x128xbf16, #tpu.memory_space<vmem>>, %arg4: memref<128x128xbf16, #tpu.memory_space<vmem>>, %arg5: memref<128x128xbf16, #tpu.memory_space<vmem>>, %arg6: memref<128x128xbf16, #tpu.memory_space<vmem>>, %arg7: memref<128x128xbf16, #tpu.memory_space<vmem>>, %arg8: memref<1x128xf32, #tpu.memory_space<vmem>>, %arg9: memref<1x128xf32, #tpu.memory_space<vmem>>, %arg10: memref<1x128xf32, #tpu.memory_space<vmem>>, %arg11: memref<1x128xf32, #tpu.memory_space<vmem>>, %arg12: memref<16x128xf32, #tpu.memory_space<vmem>>, %arg13: memref<16x128xf32, #tpu.memory_space<vmem>>) attributes {dimension_semantics = [#tpu.dimension_semantics<parallel>], iteration_bounds = array<i64: 1>, scalar_prefetch = 0 : i64, scratch_operands = 0 : i64, tpu.core_type = #tpu.core_type<tc>, window_params = [{transform_indices = @transform_0, window_bounds = array<i64: 16, 1024>}, {transform_indices = @transform_1, window_bounds = array<i64: 16, 128>}, {pipeline_mode = #tpu.pipeline_mode<synchronous>, transform_indices = @transform_2, window_bounds = array<i64: 1024, 128>}, {pipeline_mode = #tpu.pipeline_mode<synchronous>, transform_indices = @transform_3, window_bounds = array<i64: 128, 128>}, {pipeline_mode = #tpu.pipeline_mode<synchronous>, transform_indices = @transform_4, window_bounds = array<i64: 128, 128>}, {pipeline_mode = #tpu.pipeline_mode<synchronous>, transform_indices = @transform_5, window_bounds = array<i64: 128, 128>}, {pipeline_mode = #tpu.pipeline_mode<synchronous>, transform_indices = @transform_6, window_bounds = array<i64: 128, 128>}, {pipeline_mode = #tpu.pipeline_mode<synchronous>, transform_indices = @transform_7, window_bounds = array<i64: 1, 128>}, {pipeline_mode = #tpu.pipeline_mode<synchronous>, transform_indices = @transform_8, window_bounds = array<i64: 1, 128>}, {pipeline_mode = #tpu.pipeline_mode<synchronous>, transform_indices = @transform_9, window_bounds = array<i64: 1, 128>}, {pipeline_mode = #tpu.pipeline_mode<synchronous>, transform_indices = @transform_10, window_bounds = array<i64: 1, 128>}, {transform_indices = @transform_11, window_bounds = array<i64: 16, 128>}, {transform_indices = @transform_12, window_bounds = array<i64: 16, 128>}]} {
    %c0 = arith.constant 0 : index
    %c0_0 = arith.constant 0 : index
    %0 = vector.load %arg1[%c0, %c0_0] : memref<16x1024xbf16, #tpu.memory_space<vmem>>, vector<16x1024xbf16>
    %c0_1 = arith.constant 0 : index
    %c0_2 = arith.constant 0 : index
    %1 = vector.load %arg3[%c0_1, %c0_2] : memref<1024x128xbf16, #tpu.memory_space<vmem>>, vector<1024x128xbf16>
    %cst = arith.constant dense<0.000000e+00> : vector<16x128xf32>
    %2 = tpu.matmul %0, %1, %cst {dimension_numbers = #tpu.dot_dimension_numbers<[1], [0], [0], [1], [0, 0, 1, 1], [], []>} : vector<16x1024xbf16>, vector<1024x128xbf16>, vector<16x128xf32> -> vector<16x128xf32>
    %c0_3 = arith.constant 0 : index
    %c0_4 = arith.constant 0 : index
    %3 = vector.load %arg8[%c0_3, %c0_4] : memref<1x128xf32, #tpu.memory_space<vmem>>, vector<1x128xf32>
    %4 = vector.broadcast %3 : vector<1x128xf32> to vector<16x128xf32>
    %5 = arith.addf %2, %4 : vector<16x128xf32>
    %cst_5 = arith.constant 0.000000e+00 : f32
    %6 = vector.broadcast %cst_5 : f32 to vector<16x128xf32>
    %7 = arith.maximumf %5, %6 : vector<16x128xf32>
    %c0_6 = arith.constant 0 : index
    %c0_7 = arith.constant 0 : index
    %8 = vector.load %arg2[%c0_6, %c0_7] : memref<16x128xbf16, #tpu.memory_space<vmem>>, vector<16x128xbf16>
    %c0_8 = arith.constant 0 : index
    %c0_9 = arith.constant 0 : index
    %9 = vector.load %arg4[%c0_8, %c0_9] : memref<128x128xbf16, #tpu.memory_space<vmem>>, vector<128x128xbf16>
    %cst_10 = arith.constant dense<0.000000e+00> : vector<16x128xf32>
    %10 = tpu.matmul %8, %9, %cst_10 {dimension_numbers = #tpu.dot_dimension_numbers<[1], [0], [0], [1], [0, 0, 1, 1], [], []>} : vector<16x128xbf16>, vector<128x128xbf16>, vector<16x128xf32> -> vector<16x128xf32>
    %c0_11 = arith.constant 0 : index
    %c0_12 = arith.constant 0 : index
    %11 = vector.load %arg9[%c0_11, %c0_12] : memref<1x128xf32, #tpu.memory_space<vmem>>, vector<1x128xf32>
    %12 = vector.broadcast %11 : vector<1x128xf32> to vector<16x128xf32>
    %13 = arith.addf %10, %12 : vector<16x128xf32>
    %cst_13 = arith.constant 0.000000e+00 : f32
    %14 = vector.broadcast %cst_13 : f32 to vector<16x128xf32>
    %15 = arith.maximumf %13, %14 : vector<16x128xf32>
    %16 = arith.truncf %7 : vector<16x128xf32> to vector<16x128xbf16>
    %17 = arith.truncf %15 : vector<16x128xf32> to vector<16x128xbf16>
    %c0_14 = arith.constant 0 : index
    %c0_15 = arith.constant 0 : index
    %18 = vector.load %arg5[%c0_14, %c0_15] : memref<128x128xbf16, #tpu.memory_space<vmem>>, vector<128x128xbf16>
    %cst_16 = arith.constant dense<0.000000e+00> : vector<16x128xf32>
    %19 = tpu.matmul %16, %18, %cst_16 {dimension_numbers = #tpu.dot_dimension_numbers<[1], [0], [0], [1], [0, 0, 1, 1], [], []>} : vector<16x128xbf16>, vector<128x128xbf16>, vector<16x128xf32> -> vector<16x128xf32>
    %c0_17 = arith.constant 0 : index
    %c0_18 = arith.constant 0 : index
    %20 = vector.load %arg6[%c0_17, %c0_18] : memref<128x128xbf16, #tpu.memory_space<vmem>>, vector<128x128xbf16>
    %cst_19 = arith.constant dense<0.000000e+00> : vector<16x128xf32>
    %21 = tpu.matmul %17, %20, %cst_19 {dimension_numbers = #tpu.dot_dimension_numbers<[1], [0], [0], [1], [0, 0, 1, 1], [], []>} : vector<16x128xbf16>, vector<128x128xbf16>, vector<16x128xf32> -> vector<16x128xf32>
    %22 = arith.addf %19, %21 : vector<16x128xf32>
    %c0_20 = arith.constant 0 : index
    %c0_21 = arith.constant 0 : index
    %23 = vector.load %arg10[%c0_20, %c0_21] : memref<1x128xf32, #tpu.memory_space<vmem>>, vector<1x128xf32>
    %24 = vector.broadcast %23 : vector<1x128xf32> to vector<16x128xf32>
    %25 = arith.addf %22, %24 : vector<16x128xf32>
    %c0_22 = arith.constant 0 : index
    %c0_23 = arith.constant 0 : index
    %26 = vector.load %arg13[%c0_22, %c0_23] : memref<16x128xf32, #tpu.memory_space<vmem>>, vector<16x128xf32>
    tpu.vector_store %arg13[%c0_22, %c0_23], %25 {strides = array<i32>} : memref<16x128xf32, #tpu.memory_space<vmem>>, vector<16x128xf32>,
    %27 = arith.mulf %25, %25 : vector<16x128xf32>
    %28 = arith.mulf %25, %27 : vector<16x128xf32>
    %cst_24 = arith.constant 4.471500e-02 : f32
    %29 = vector.broadcast %cst_24 : f32 to vector<16x128xf32>
    %30 = arith.mulf %29, %28 : vector<16x128xf32>
    %31 = arith.addf %25, %30 : vector<16x128xf32>
    %cst_25 = arith.constant 0.797884583 : f32
    %32 = vector.broadcast %cst_25 : f32 to vector<16x128xf32>
    %33 = arith.mulf %32, %31 : vector<16x128xf32>
    %34 = math.tanh %33 : vector<16x128xf32>
    %cst_26 = arith.constant 1.000000e+00 : f32
    %35 = vector.broadcast %cst_26 : f32 to vector<16x128xf32>
    %36 = arith.addf %35, %34 : vector<16x128xf32>
    %cst_27 = arith.constant 5.000000e-01 : f32
    %37 = vector.broadcast %cst_27 : f32 to vector<16x128xf32>
    %38 = arith.mulf %37, %36 : vector<16x128xf32>
    %39 = arith.mulf %25, %38 : vector<16x128xf32>
    %40 = arith.truncf %39 : vector<16x128xf32> to vector<16x128xbf16>
    %c0_28 = arith.constant 0 : index
    %c0_29 = arith.constant 0 : index
    %41 = vector.load %arg7[%c0_28, %c0_29] : memref<128x128xbf16, #tpu.memory_space<vmem>>, vector<128x128xbf16>
    %cst_30 = arith.constant dense<0.000000e+00> : vector<16x128xf32>
    %42 = tpu.matmul %40, %41, %cst_30 {dimension_numbers = #tpu.dot_dimension_numbers<[1], [0], [0], [1], [0, 0, 1, 1], [], []>} : vector<16x128xbf16>, vector<128x128xbf16>, vector<16x128xf32> -> vector<16x128xf32>
    %c0_31 = arith.constant 0 : index
    %c0_32 = arith.constant 0 : index
    %43 = vector.load %arg11[%c0_31, %c0_32] : memref<1x128xf32, #tpu.memory_space<vmem>>, vector<1x128xf32>
    %44 = vector.broadcast %43 : vector<1x128xf32> to vector<16x128xf32>
    %45 = arith.addf %42, %44 : vector<16x128xf32>
    %c0_33 = arith.constant 0 : index
    %c0_34 = arith.constant 0 : index
    %46 = vector.load %arg12[%c0_33, %c0_34] : memref<16x128xf32, #tpu.memory_space<vmem>>, vector<16x128xf32>
    tpu.vector_store %arg12[%c0_33, %c0_34], %45 {strides = array<i32>} : memref<16x128xf32, #tpu.memory_space<vmem>>, vector<16x128xf32>,
    return
  }
  func.func @transform_0(%arg0: i32) -> (i32, i32) {
    %c0_i32 = arith.constant 0 : i32
    %c0_i32_0 = arith.constant 0 : i32
    return %arg0, %c0_i32 : i32, i32
  }
  func.func @transform_1(%arg0: i32) -> (i32, i32) {
    %c0_i32 = arith.constant 0 : i32
    %c0_i32_0 = arith.constant 0 : i32
    return %arg0, %c0_i32 : i32, i32
  }
  func.func @transform_2(%arg0: i32) -> (i32, i32) {
    %c0_i32 = arith.constant 0 : i32
    %c0_i32_0 = arith.constant 0 : i32
    %c0_i32_1 = arith.constant 0 : i32
    return %c0_i32, %c0_i32_0 : i32, i32
  }
  func.func @transform_3(%arg0: i32) -> (i32, i32) {
    %c0_i32 = arith.constant 0 : i32
    %c0_i32_0 = arith.constant 0 : i32
    %c0_i32_1 = arith.constant 0 : i32
    return %c0_i32, %c0_i32_0 : i32, i32
  }
  func.func @transform_4(%arg0: i32) -> (i32, i32) {
    %c0_i32 = arith.constant 0 : i32
    %c0_i32_0 = arith.constant 0 : i32
    %c0_i32_1 = arith.constant 0 : i32
    return %c0_i32, %c0_i32_0 : i32, i32
  }
  func.func @transform_5(%arg0: i32) -> (i32, i32) {
    %c0_i32 = arith.constant 0 : i32
    %c0_i32_0 = arith.constant 0 : i32
    %c0_i32_1 = arith.constant 0 : i32
    return %c0_i32, %c0_i32_0 : i32, i32
  }
  func.func @transform_6(%arg0: i32) -> (i32, i32) {
    %c0_i32 = arith.constant 0 : i32
    %c0_i32_0 = arith.constant 0 : i32
    %c0_i32_1 = arith.constant 0 : i32
    return %c0_i32, %c0_i32_0 : i32, i32
  }
  func.func @transform_7(%arg0: i32) -> (i32, i32) {
    %c0_i32 = arith.constant 0 : i32
    %c0_i32_0 = arith.constant 0 : i32
    %c0_i32_1 = arith.constant 0 : i32
    return %c0_i32, %c0_i32_0 : i32, i32
  }
  func.func @transform_8(%arg0: i32) -> (i32, i32) {
    %c0_i32 = arith.constant 0 : i32
    %c0_i32_0 = arith.constant 0 : i32
    %c0_i32_1 = arith.constant 0 : i32
    return %c0_i32, %c0_i32_0 : i32, i32
  }
  func.func @transform_9(%arg0: i32) -> (i32, i32) {
    %c0_i32 = arith.constant 0 : i32
    %c0_i32_0 = arith.constant 0 : i32
    %c0_i32_1 = arith.constant 0 : i32
    return %c0_i32, %c0_i32_0 : i32, i32
  }
  func.func @transform_10(%arg0: i32) -> (i32, i32) {
    %c0_i32 = arith.constant 0 : i32
    %c0_i32_0 = arith.constant 0 : i32
    %c0_i32_1 = arith.constant 0 : i32
    return %c0_i32, %c0_i32_0 : i32, i32
  }
  func.func @transform_11(%arg0: i32) -> (i32, i32) {
    %c0_i32 = arith.constant 0 : i32
    %c0_i32_0 = arith.constant 0 : i32
    return %arg0, %c0_i32 : i32, i32
  }
  func.func @transform_12(%arg0: i32) -> (i32, i32) {
    %c0_i32 = arith.constant 0 : i32
    %c0_i32_0 = arith.constant 0 : i32
    return %arg0, %c0_i32 : i32, i32
  }
}

</mosaic_0001>

<bundles_post_ra>
// kernel: _fused_meta_forward.1
= control target key start
LH: loop header
LB: loop body
LE: loop exit
PB: predicated region body
PF: predicated region fallthrough
CT: control target
= control target key end

     0   :  { %18 = vsyncpa [#allocation3], 0  ;;  %s1718_s21 = smov [#allocation2]   ;;  %s1987_s0 = inlined_call_operand.vmem [shape: bf16[16,1024], index: 0, kind: input, shape index: {}]   ;;  %s1988_s1 = inlined_call_operand.vmem [shape: bf16[16,128], index: 1, kind: input, shape index: {}]   ;;  %s1989_s2 = inlined_call_operand.hbm [shape: bf16[1024,128], index: 2, kind: input, shape index: {}]   ;;  %s1990_s3 = inlined_call_operand.vmem [shape: bf16[128,128], index: 3, kind: input, shape index: {}]   ;;  %s1991_s4 = inlined_call_operand.vmem [shape: bf16[128,128], index: 4, kind: input, shape index: {}]   ;;  %s1992_s5 = inlined_call_operand.vmem [shape: bf16[128,128], index: 5, kind: input, shape index: {}]   ;;  %s1993_s6 = inlined_call_operand.vmem [shape: bf16[128,128], index: 6, kind: input, shape index: {}]   ;;  %s1994_s7 = inlined_call_operand.vmem [shape: f32[1,128], index: 7, kind: input, shape index: {}]   ;;  %s1995_s8 = inlined_call_operand.vmem [shape: f32[1,128], index: 8, kind: input, shape index: {}]   ;;  %s1996_s9 = inlined_call_operand.vmem [shape: f32[1,128], index: 9, kind: input, shape index: {}]   ;;  %s1997_s10 = inlined_call_operand.vmem [shape: f32[1,128], index: 10, kind: input, shape index: {}]   ;;  %s1998_s11 = inlined_call_operand.vmem [shape: f32[16,128], index: 11, kind: output, shape index: {0}]   ;;  %s1999_s12 = inlined_call_operand.vmem [shape: f32[16,128], index: 12, kind: output, shape index: {1}]  }
   0x1   :  { %s28_s22 = sshll.u32 %s1718_s21, 4  ;;  %s1694_s25 = scalar_lea.hbm %s1989_s2, 8192  ;;  %s29_s22 = int_to_ptr.vmem [resolvable:$true] %s28_s22 }
   0x2   :  { %p1695_p0 = scmp.ne.s32.totalorder %s1989_s2, %s1694_s25  ;;  %p1698_p1 = scmp.lt.u32.totalorder %s1694_s25, %s1989_s2 }
   0x4   :  { %p1700_p2 = pnand %p1698_p1, %p1695_p0 }
   0x6   :  { %1703 = shalt.err (!%p1700_p2)
}
   0x7   :  { %s1704_s30 = scalar_lea.vmem %s29_s22, 8192  ;;  %p1709_p4 = scmp.lt.s32.totalorder %s29_s22, %s29_s22 }
   0x8   :  { %p1705_p3 = scmp.ne.s32.totalorder %s29_s22, %s1704_s30  ;;  %p1710_p5 = scmp.lt.s32.totalorder %s1704_s30, %s1704_s30 }
   0xa   :  { %p1711_p6 = por %p1710_p5, %p1709_p4 }
   0xc   :  { %p1712_p7 = pnand %p1711_p6, %p1705_p3 }
   0xe   :  { %1715 = shalt.err (!%p1712_p7)
}
   0xf   :  { %s1719_s13 = smov 64   ;;  %s1720_s14 = smov 4  }
  0x10   :  { %34 = dma.hbm_to_vmem [thread:$0]  %s1989_s2, 8192, %s29_s22, [#allocation3], %s1719_s13, %s1719_s13, %s1720_s14  }
  0x11   :  { %1716 = dma.done.wait [#allocation3], 8192  }
  0x12   :  { %1717 = vsyncadd [#allocation3], 4294959104  ;;  %v1593_v0 = vld [vmem:[#allocation2 + $0x40] sm:$0xff]   ;;  %v1597_v4 = vld [vmem:[#allocation2 + $0x48] sm:$0xff]   ;;  %vm1722_vm0 = vmmov 0  }
  0x13   :  { %v1594_v1 = vld [vmem:[#allocation2] sm:$0xff]   ;;  %1384 = vmatprep.subr.bf16.mxu0 %v1593_v0  ;;  %v1598_v5 = vld [vmem:[#allocation2 + $0x8] sm:$0xff]   ;;  %v1601_v8 = vld [vmem:[#allocation2 + $0x50] sm:$0xff]  }
  0x14   :  { %v1595_v2 = vld [vmem:[#allocation2 + $0xc0] sm:$0xff]   ;;  %1385 = vmatpush3.bf16.msra.mxu0 %v1594_v1  ;;  %v1599_v6 = vld [vmem:[#allocation2 + $0xc8] sm:$0xff]   ;;  %v1602_v9 = vld [vmem:[#allocation2 + $0x10] sm:$0xff]  }
  0x15   :  { %v1596_v3 = vld [vmem:[#allocation2 + $0x80] sm:$0xff]   ;;  %1406 = vmatprep.subr.bf16.mxu1 %v1595_v2  ;;  %1386 = vmatprep.subr.bf16.mxu0 %v1597_v4  ;;  %v1600_v7 = vld [vmem:[#allocation2 + $0x88] sm:$0xff]   ;;  %v1603_v10 = vld [vmem:[#allocation2 + $0xd0] sm:$0xff]  }
  0x16   :  { %1407 = vmatpush3.bf16.msra.mxu1 %v1596_v3  ;;  %v1604_v11 = vld [vmem:[#allocation2 + $0x90] sm:$0xff]   ;;  %v1605_v12 = vld [vmem:[#allocation2 + $0x58] sm:$0xff]   ;;  %v1609_v16 = vld [vmem:[#allocation2 + $0x60] sm:$0xff]  }
  0x17   :  { %1408 = vmatprep.subr.bf16.mxu1 %v1599_v6  ;;  %v1606_v13 = vld [vmem:[#allocation2 + $0x18] sm:$0xff]   ;;  %v1610_v17 = vld [vmem:[#allocation2 + $0x20] sm:$0xff]   ;;  %v1613_v20 = vld [vmem:[#allocation2 + $0x68] sm:$0xff]  }
  0x18   :  { %1387 = vmatpush3.bf16.msra.mxu0 %v1598_v5  ;;  %v1607_v14 = vld [vmem:[#allocation2 + $0xd8] sm:$0xff]   ;;  %v1611_v18 = vld [vmem:[#allocation2 + $0xe0] sm:$0xff]   ;;  %v1614_v21 = vld [vmem:[#allocation2 + $0x28] sm:$0xff]  }
  0x19   :  { %1388 = vmatprep.subr.bf16.mxu0 %v1601_v8  ;;  %v1608_v15 = vld [vmem:[#allocation2 + $0x98] sm:$0xff]   ;;  %v1612_v19 = vld [vmem:[#allocation2 + $0xa0] sm:$0xff]   ;;  %v1615_v22 = vld [vmem:[#allocation2 + $0xe8] sm:$0xff]  }
  0x1a   :  { %1409 = vmatpush3.bf16.msra.mxu1 %v1600_v7  ;;  %v1616_v23 = vld [vmem:[#allocation2 + $0xa8] sm:$0xff]   ;;  %v1617_v24 = vld [vmem:[#allocation2 + $0x70] sm:$0xff]   ;;  %v1621_v28 = vld [vmem:[#allocation2 + $0x78] sm:$0xff]  }
  0x1b   :  { %1410 = vmatprep.subr.bf16.mxu1 %v1603_v10  ;;  %v1618_v25 = vld [vmem:[#allocation2 + $0x30] sm:$0xff]   ;;  %v1622_v29 = vld [vmem:[#allocation2 + $0x38] sm:$0xff]   ;;  %v55_v31 = vld [vmem:[%s1987_s0] sm:$0xff] }
  0x1c   :  { %1389 = vmatpush3.bf16.msra.mxu0 %v1602_v9  ;;  %v1619_v26 = vld [vmem:[#allocation2 + $0xf0] sm:$0xff]   ;;  %v1623_v30 = vld [vmem:[#allocation2 + $0xf8] sm:$0xff]   ;;  %v59_v32 = vld [vmem:[%s1987_s0 + $0x20] sm:$0xff] }
  0x1d   :  { %1390 = vmatprep.subr.bf16.mxu0 %v1605_v12  ;;  %v1620_v27 = vld [vmem:[#allocation2 + $0xb0] sm:$0xff]   ;;  %v1276_v33 = vcombine.low %v55_v31, %v59_v32  ;;  %v1277_v34 = vcombine.high %v55_v31, %v59_v32  ;;  %v1624_v35 = vld [vmem:[#allocation2 + $0xb8] sm:$0xff]   ;;  %v1625_v36 = vld [vmem:[#allocation2 + $0x140] sm:$0xff]   ;;  %v1721_v12 = vmov 0.0  }
  0x1e   :  { %1411 = vmatpush3.bf16.msra.mxu1 %v1604_v11  ;;  %v56_v37 = vld [vmem:[%s1987_s0 + $0x8] sm:$0xff]  ;;  %v1626_v41 = vld [vmem:[#allocation2 + $0x100] sm:$0xff]   ;;  %v1633_v48 = vld [vmem:[#allocation2 + $0x150] sm:$0xff]  }
  0x1f   :  { %1412 = vmatprep.subr.bf16.mxu1 %v1607_v14  ;;  %654 = vmatprep.mubr.bf16.mxu0 %v1277_v34  ;;  %v60_v38 = vld [vmem:[%s1987_s0 + $0x28] sm:$0xff]  ;;  %v1627_v42 = vld [vmem:[#allocation2 + $0x1c0] sm:$0xff]   ;;  %v1634_v49 = vld [vmem:[#allocation2 + $0x110] sm:$0xff]  }
  0x20   :  { %1391 = vmatpush3.bf16.msra.mxu0 %v1606_v13  ;;  %v1278_v39 = vcombine.low %v56_v37, %v60_v38  ;;  %v1279_v40 = vcombine.high %v56_v37, %v60_v38  ;;  %v1628_v43 = vld [vmem:[#allocation2 + $0x180] sm:$0xff]   ;;  %v1629_v44 = vld [vmem:[#allocation2 + $0x148] sm:$0xff]   ;;  %v1635_v50 = vld [vmem:[#allocation2 + $0x1d0] sm:$0xff]  }
  0x21   :  { %1392 = vmatprep.subr.bf16.mxu0 %v1609_v16  ;;  %v1630_v45 = vld [vmem:[#allocation2 + $0x108] sm:$0xff]   ;;  %v1636_v51 = vld [vmem:[#allocation2 + $0x190] sm:$0xff]   ;;  %v1637_v52 = vld [vmem:[#allocation2 + $0x158] sm:$0xff]  }
  0x22   :  { %1413 = vmatpush3.bf16.msra.mxu1 %v1608_v15  ;;  %695 = vmatprep.mubr.bf16.mxu1 %v1279_v40  ;;  %v1631_v46 = vld [vmem:[#allocation2 + $0x1c8] sm:$0xff]   ;;  %v1638_v53 = vld [vmem:[#allocation2 + $0x118] sm:$0xff]   ;;  %v1641_v56 = vld [vmem:[#allocation2 + $0x160] sm:$0xff]  }
  0x23   :  { %1414 = vmatprep.subr.bf16.mxu1 %v1611_v18  ;;  %v1632_v47 = vld [vmem:[#allocation2 + $0x188] sm:$0xff]   ;;  %v1639_v54 = vld [vmem:[#allocation2 + $0x1d8] sm:$0xff]   ;;  %v1642_v57 = vld [vmem:[#allocation2 + $0x120] sm:$0xff]  }
  0x24   :  { %1393 = vmatpush3.bf16.msra.mxu0 %v1610_v17  ;;  %v1640_v55 = vld [vmem:[#allocation2 + $0x198] sm:$0xff]   ;;  %v1643_v58 = vld [vmem:[#allocation2 + $0x1e0] sm:$0xff]   ;;  %v1645_v60 = vld [vmem:[#allocation2 + $0x168] sm:$0xff]  }
  0x25   :  { %1394 = vmatprep.subr.bf16.mxu0 %v1613_v20  ;;  %v1644_v59 = vld [vmem:[#allocation2 + $0x1a0] sm:$0xff]   ;;  %v1646_v61 = vld [vmem:[#allocation2 + $0x128] sm:$0xff]   ;;  %v1649_v0 = vld [vmem:[#allocation2 + $0x170] sm:$0xff]  }
  0x26   :  { %1415 = vmatpush3.bf16.msra.mxu1 %v1612_v19  ;;  %v1647_v62 = vld [vmem:[#allocation2 + $0x1e8] sm:$0xff]   ;;  %v1650_v1 = vld [vmem:[#allocation2 + $0x130] sm:$0xff]   ;;  %v1653_v4 = vld [vmem:[#allocation2 + $0x178] sm:$0xff]  }
  0x27   :  { %1416 = vmatprep.subr.bf16.mxu1 %v1615_v22  ;;  %v1648_v63 = vld [vmem:[#allocation2 + $0x1a8] sm:$0xff]   ;;  %v1651_v2 = vld [vmem:[#allocation2 + $0x1f0] sm:$0xff]   ;;  %v1654_v5 = vld [vmem:[#allocation2 + $0x138] sm:$0xff]  }
  0x28   :  { %1395 = vmatpush3.bf16.msra.mxu0 %v1614_v21  ;;  %v1652_v3 = vld [vmem:[#allocation2 + $0x1b0] sm:$0xff]   ;;  %v1655_v6 = vld [vmem:[#allocation2 + $0x1f8] sm:$0xff]   ;;  %v1657_v17 = vld [vmem:[%s1990_s3] sm:$0xff]  }
  0x29   :  { %1396 = vmatprep.subr.bf16.mxu0 %v1617_v24  ;;  %v57_v7 = vld [vmem:[%s1987_s0 + $0x10] sm:$0xff]  ;;  %v1656_v11 = vld [vmem:[#allocation2 + $0x1b8] sm:$0xff]   ;;  %v1658_v18 = vld [vmem:[%s1990_s3 + $0x8] sm:$0xff]  }
  0x2a   :  { %1417 = vmatpush3.bf16.msra.mxu1 %v1616_v23  ;;  %v61_v8 = vld [vmem:[%s1987_s0 + $0x30] sm:$0xff]  ;;  %v58_v13 = vld [vmem:[%s1987_s0 + $0x18] sm:$0xff]  ;;  %v1661_v21 = vld [vmem:[%s1990_s3 + $0x20] sm:$0xff]  }
  0x2b   :  { %1418 = vmatprep.subr.bf16.mxu1 %v1619_v26  ;;  %v1280_v9 = vcombine.low %v57_v7, %v61_v8  ;;  %v1281_v10 = vcombine.high %v57_v7, %v61_v8  ;;  %v62_v14 = vld [vmem:[%s1987_s0 + $0x38] sm:$0xff]  ;;  %v1659_v19 = vld [vmem:[%s1990_s3 + $0x10] sm:$0xff]   ;;  %v1662_v22 = vld [vmem:[%s1990_s3 + $0x28] sm:$0xff]  }
  0x2c   :  { %1397 = vmatpush3.bf16.msra.mxu0 %v1618_v25  ;;  %v1282_v15 = vcombine.low %v58_v13, %v62_v14  ;;  %v1283_v16 = vcombine.high %v58_v13, %v62_v14  ;;  %v1660_v20 = vld [vmem:[%s1990_s3 + $0x18] sm:$0xff]   ;;  %v1663_v23 = vld [vmem:[%s1990_s3 + $0x30] sm:$0xff]   ;;  %v1665_v25 = vld [vmem:[%s1988_s1] sm:$0xff]  }
  0x2d   :  { %1398 = vmatprep.subr.bf16.mxu0 %v1621_v28  ;;  %v1664_v24 = vld [vmem:[%s1990_s3 + $0x38] sm:$0xff]   ;;  %v1666_v26 = vld [vmem:[%s1991_s4] sm:$0xff]   ;;  %v1668_v28 = vld [vmem:[%s1991_s4 + $0x10] sm:$0xff]  }
  0x2e   :  { %1419 = vmatpush3.bf16.msra.mxu1 %v1620_v27  ;;  %v1667_v27 = vld [vmem:[%s1991_s4 + $0x8] sm:$0xff]   ;;  %v1672_v32 = vld [vmem:[%s1991_s4 + $0x30] sm:$0xff]   ;;  %v1674_v34 = vld [vmem:[%s1991_s4 + $0x38] sm:$0xff]  }
  0x2f   :  { %1420 = vmatprep.subr.bf16.mxu1 %v1623_v30  ;;  %v1670_v30 = vld [vmem:[%s1991_s4 + $0x20] sm:$0xff]   ;;  %v1671_v31 = vld [vmem:[%s1991_s4 + $0x28] sm:$0xff]   ;;  %v1677_v37 = vld [vmem:[%s1992_s5 + $0x18] sm:$0xff]  }
  0x30   :  { %1399 = vmatpush3.bf16.msra.mxu0 %v1622_v29  ;;  %v1669_v29 = vld [vmem:[%s1991_s4 + $0x18] sm:$0xff]   ;;  %v1678_v38 = vld [vmem:[%s1992_s5 + $0x20] sm:$0xff]   ;;  %v1680_v40 = vld [vmem:[%s1992_s5 + $0x30] sm:$0xff]  }
  0x31   :  { %1428 = vmatprep.subr.bf16.mxu0 %v1625_v36  ;;  %v1676_v36 = vld [vmem:[%s1992_s5 + $0x10] sm:$0xff]  }
  0x32   :  { %1421 = vmatpush3.bf16.msra.mxu1 %v1624_v35  ;;  %v1675_v35 = vld [vmem:[%s1992_s5 + $0x8] sm:$0xff]  }
  0x33   :  { %655 = vmatmul.mubr.bf16.vlgmr.msra.gmra.mrb[0].mxu0 %v1276_v33  ;;  %1450 = vmatprep.subr.bf16.mxu1 %v1627_v42  ;;  %v1673_v33 = vld [vmem:[%s1992_s5] sm:$0xff]  }
  0x34   :  { %1429 = vmatpush3.bf16.msra.mxu0 %v1626_v41  ;;  %736 = vmatprep.mubr.bf16.mxu0 %v1281_v10  ;;  %v1681_v41 = vld [vmem:[%s1992_s5 + $0x38] sm:$0xff]  }
  0x35   :  { %696 = vmatmul.mubr.bf16.vlgmr.msra.gmra.mrb[0].mxu1 %v1278_v39  ;;  %1430 = vmatprep.subr.bf16.mxu0 %v1629_v44  ;;  %v1679_v39 = vld [vmem:[%s1992_s5 + $0x28] sm:$0xff]  }
  0x36   :  { %1451 = vmatpush3.bf16.msra.mxu1 %v1628_v43  ;;  %777 = vmatprep.mubr.bf16.mxu1 %v1283_v16  ;;  %v1275_v43 = vld [vmem:[%s1994_s7] ss:$0 sm:$0xff] }
  0x37   :  { %1452 = vmatprep.subr.bf16.mxu1 %v1631_v46 }
  0x38   :  { %1431 = vmatpush3.bf16.msra.mxu0 %v1630_v45 }
  0x39   :  { %1432 = vmatprep.subr.bf16.mxu0 %v1633_v48 }
  0x3a   :  { %1453 = vmatpush3.bf16.msra.mxu1 %v1632_v47 }
  0x3b   :  { %1454 = vmatprep.subr.bf16.mxu1 %v1635_v50 }
  0x3c   :  { %1433 = vmatpush3.bf16.msra.mxu0 %v1634_v49 }
  0x3d   :  { %1434 = vmatprep.subr.bf16.mxu0 %v1637_v52 }
  0x3e   :  { %1455 = vmatpush3.bf16.msra.mxu1 %v1636_v51 }
  0x3f   :  { %1456 = vmatprep.subr.bf16.mxu1 %v1639_v54 }
  0x40   :  { %1435 = vmatpush3.bf16.msra.mxu0 %v1638_v53 }
  0x41   :  { %1436 = vmatprep.subr.bf16.mxu0 %v1641_v56 }
  0x42   :  { %1457 = vmatpush3.bf16.msra.mxu1 %v1640_v55 }
  0x43   :  { %1458 = vmatprep.subr.bf16.mxu1 %v1643_v58 }
  0x44   :  { %1437 = vmatpush3.bf16.msra.mxu0 %v1642_v57 }
  0x45   :  { %1438 = vmatprep.subr.bf16.mxu0 %v1645_v60 }
  0x46   :  { %1459 = vmatpush3.bf16.msra.mxu1 %v1644_v59 }
  0x47   :  { %1460 = vmatprep.subr.bf16.mxu1 %v1647_v62 }
  0x48   :  { %1439 = vmatpush3.bf16.msra.mxu0 %v1646_v61 }
  0x49   :  { %1440 = vmatprep.subr.bf16.mxu0 %v1649_v0 }
  0x4a   :  { %1461 = vmatpush3.bf16.msra.mxu1 %v1648_v63 }
  0x4b   :  { %1462 = vmatprep.subr.bf16.mxu1 %v1651_v2 }
  0x4c   :  { %1441 = vmatpush3.bf16.msra.mxu0 %v1650_v1 }
  0x4d   :  { %1442 = vmatprep.subr.bf16.mxu0 %v1653_v4 }
  0x4e   :  { %1463 = vmatpush3.bf16.msra.mxu1 %v1652_v3 }
  0x4f   :  { %1464 = vmatprep.subr.bf16.mxu1 %v1655_v6 }
  0x50   :  { %1443 = vmatpush3.bf16.msra.mxu0 %v1654_v5 }
  0x51   :  { %1508 = vmatprep.subr.bf16.mxu0 %v1721_v12 }
  0x52   :  { %1465 = vmatpush3.bf16.msra.mxu1 %v1656_v11 }
  0x53   :  { %737 = vmatmul.mubr.bf16.vlgmr.msra.gmra.mrb[4].mxu0 %v1280_v9  ;;  %1528 = vmatprep.subr.bf16.mxu1 %v1721_v12 }
  0x54   :  { %1509 = vmatpush3.bf16.msra.mxu0 %v1657_v17  ;;  %1524 = vmatprep.mubr.msk.bf16.mxu0 %vm1722_vm0, %v1721_v12 }
  0x55   :  { %778 = vmatmul.mubr.bf16.vlgmr.msra.gmra.mrb[4].mxu1 %v1282_v15  ;;  %1510 = vmatprep.subr.bf16.mxu0 %v1721_v12  ;;  %v1348_v15 = vld [vmem:[%s1995_s8] ss:$0 sm:$0xff] }
  0x56   :  { %1544 = vmatprep.mubr.msk.bf16.mxu1 %vm1722_vm0, %v1721_v12  ;;  %1529 = vmatpush3.bf16.msra.mxu1 %v1673_v33 }
  0x57   :  { %1530 = vmatprep.subr.bf16.mxu1 %v1721_v12 }
  0x58   :  { %1511 = vmatpush3.bf16.msra.mxu0 %v1658_v18 }
  0x59   :  { %1512 = vmatprep.subr.bf16.mxu0 %v1721_v12 }
  0x5a   :  { %1531 = vmatpush3.bf16.msra.mxu1 %v1675_v35 }
  0x5b   :  { %1532 = vmatprep.subr.bf16.mxu1 %v1721_v12 }
  0x5c   :  { %1513 = vmatpush3.bf16.msra.mxu0 %v1659_v19 }
  0x5d   :  { %1514 = vmatprep.subr.bf16.mxu0 %v1721_v12 }
  0x5e   :  { %1533 = vmatpush3.bf16.msra.mxu1 %v1676_v36 }
  0x5f   :  { %1534 = vmatprep.subr.bf16.mxu1 %v1721_v12 }
  0x60   :  { %1515 = vmatpush3.bf16.msra.mxu0 %v1660_v20 }
  0x61   :  { %1516 = vmatprep.subr.bf16.mxu0 %v1721_v12 }
  0x62   :  { %1535 = vmatpush3.bf16.msra.mxu1 %v1677_v37 }
  0x63   :  { %1536 = vmatprep.subr.bf16.mxu1 %v1721_v12 }
  0x64   :  { %1517 = vmatpush3.bf16.msra.mxu0 %v1661_v21 }
  0x65   :  { %1518 = vmatprep.subr.bf16.mxu0 %v1721_v12 }
  0x66   :  { %1537 = vmatpush3.bf16.msra.mxu1 %v1678_v38  ;;  %v1374_v38 = vld [vmem:[%s1996_s9] ss:$0 sm:$0xff] }
  0x67   :  { %1538 = vmatprep.subr.bf16.mxu1 %v1721_v12 }
  0x68   :  { %1519 = vmatpush3.bf16.msra.mxu0 %v1662_v22 }
  0x69   :  { %1520 = vmatprep.subr.bf16.mxu0 %v1721_v12 }
  0x6a   :  { %1539 = vmatpush3.bf16.msra.mxu1 %v1679_v39 }
  0x6b   :  { %1540 = vmatprep.subr.bf16.mxu1 %v1721_v12 }
  0x6c   :  { %1521 = vmatpush3.bf16.msra.mxu0 %v1663_v23 }
  0x6d   :  { %1522 = vmatprep.subr.bf16.mxu0 %v1721_v12 }
  0x6e   :  { %1541 = vmatpush3.bf16.msra.mxu1 %v1680_v40 }
  0x6f   :  { %1542 = vmatprep.subr.bf16.mxu1 %v1721_v12 }
  0x70   :  { %1523 = vmatpush3.bf16.msra.mxu0 %v1664_v24 }
  0x71   :  { %1548 = vmatprep.subr.bf16.mxu0 %v1721_v12 }
  0x72   :  { %1543 = vmatpush3.bf16.msra.mxu1 %v1681_v41 }
  0x73   :  { %1525 = vmatmul.mubr.bf16.vlgmr.msra.gmra.mrb[8].mxu0 %v1665_v25  ;;  %1568 = vmatprep.subr.bf16.mxu1 %v1721_v12  ;;  %v1682_v25 = vld [vmem:[%s1993_s6] sm:$0xff]  }
  0x74   :  { %1564 = vmatprep.mubr.msk.bf16.mxu0 %vm1722_vm0, %v1721_v12  ;;  %1549 = vmatpush3.bf16.msra.mxu0 %v1666_v26  ;;  %v1683_v26 = vld [vmem:[%s1993_s6 + $0x8] sm:$0xff]  }
  0x75   :  { %1550 = vmatprep.subr.bf16.mxu0 %v1721_v12 }
  0x78   :  { %1551 = vmatpush3.bf16.msra.mxu0 %v1667_v27  ;;  %v1684_v27 = vld [vmem:[%s1993_s6 + $0x10] sm:$0xff]  }
  0x79   :  { %1552 = vmatprep.subr.bf16.mxu0 %v1721_v12 }
  0x7c   :  { %1553 = vmatpush3.bf16.msra.mxu0 %v1668_v28  ;;  %v1685_v28 = vld [vmem:[%s1993_s6 + $0x18] sm:$0xff]  }
  0x7d   :  { %1554 = vmatprep.subr.bf16.mxu0 %v1721_v12 }
  0x80   :  { %1555 = vmatpush3.bf16.msra.mxu0 %v1669_v29  ;;  %v1686_v29 = vld [vmem:[%s1993_s6 + $0x20] sm:$0xff]  }
  0x81   :  { %1556 = vmatprep.subr.bf16.mxu0 %v1721_v12 }
  0x84   :  { %1557 = vmatpush3.bf16.msra.mxu0 %v1670_v30  ;;  %v1687_v30 = vld [vmem:[%s1993_s6 + $0x28] sm:$0xff]  }
  0x85   :  { %1558 = vmatprep.subr.bf16.mxu0 %v1721_v12 }
  0x88   :  { %1559 = vmatpush3.bf16.msra.mxu0 %v1671_v31  ;;  %v1688_v31 = vld [vmem:[%s1993_s6 + $0x30] sm:$0xff]  }
  0x89   :  { %1560 = vmatprep.subr.bf16.mxu0 %v1721_v12 }
  0x8c   :  { %1561 = vmatpush3.bf16.msra.mxu0 %v1672_v32  ;;  %v1689_v32 = vld [vmem:[%s1993_s6 + $0x38] sm:$0xff]  }
  0x8d   :  { %1562 = vmatprep.subr.bf16.mxu0 %v1721_v12 }
  0x90   :  { %1563 = vmatpush3.bf16.msra.mxu0 %v1674_v34 }
 0x106   :  { %v1400_v42 = vpop.f32.mrb[0].mxu0 }
 0x107   :  { %v1401_v44 = vpop.f32.mrb[1].mxu0 }
 0x108   :  { %v1402_v45 = vadd.f32 %v1401_v44, %v1400_v42  ;;  %v1403_v46 = vpop.f32.mrb[2].mxu0  ;;  %v1422_v47 = vpop.f32.mrb[0].mxu1 }
 0x109   :  { %v1404_v48 = vpop.f32.mrb[3].mxu0  ;;  %v1423_v51 = vpop.f32.mrb[1].mxu1 }
 0x10a   :  { %v657_v49 = vadd.f32 %v1402_v45, %v1275_v43  ;;  %v1405_v50 = vadd.f32 %v1404_v48, %v1403_v46  ;;  %v1424_v52 = vadd.f32 %v1423_v51, %v1422_v47  ;;  %v1425_v53 = vpop.f32.mrb[2].mxu1 }
 0x10b   :  { %v1426_v55 = vpop.f32.mrb[3].mxu1 }
 0x10c   :  { %v660_v54 = vadd.f32 %v1405_v50, %v1275_v43  ;;  %v698_v56 = vadd.f32 %v1424_v52, %v657_v49  ;;  %v1427_v57 = vadd.f32 %v1426_v55, %v1425_v53 }
 0x10e   :  { %v701_v58 = vadd.f32 %v1427_v57, %v660_v54 }
 0x126   :  { %v1444_v59 = vpop.f32.mrb[4].mxu0 }
 0x127   :  { %v1445_v60 = vpop.f32.mrb[5].mxu0 }
 0x128   :  { %v1446_v61 = vadd.f32 %v1445_v60, %v1444_v59  ;;  %v1447_v62 = vpop.f32.mrb[6].mxu0  ;;  %v1466_v63 = vpop.f32.mrb[4].mxu1 }
 0x129   :  { %v1448_v0 = vpop.f32.mrb[7].mxu0  ;;  %v1467_v1 = vpop.f32.mrb[5].mxu1 }
 0x12a   :  { %v739_v2 = vadd.f32 %v1446_v61, %v698_v56  ;;  %v1449_v3 = vadd.f32 %v1448_v0, %v1447_v62  ;;  %v1468_v4 = vadd.f32 %v1467_v1, %v1466_v63  ;;  %v1469_v5 = vpop.f32.mrb[6].mxu1  ;;  %v1375_v0 = vld [vmem:[%s1997_s10] ss:$0 sm:$0xff] }
 0x12b   :  { %v1470_v6 = vpop.f32.mrb[7].mxu1 }
 0x12c   :  { %v742_v7 = vadd.f32 %v1449_v3, %v701_v58  ;;  %v780_v8 = vadd.f32 %v1468_v4, %v739_v2  ;;  %v1471_v9 = vadd.f32 %v1470_v6, %v1469_v5 }
 0x12e   :  { %v783_v10 = vadd.f32 %v1471_v9, %v742_v7  ;;  %v786_v11 = vmax.f32 %v780_v8, 0.0 }
 0x130   :  { %v787_v13 = vmax.f32 %v783_v10, 0.0 }
 0x132   :  { %v910_v14 = vpack.c.bf16 %v787_v13, %v786_v11 }
 0x134   :  { %1565 = vmatmul.mubr.bf16.vlgmr.msra.gmra.mrb[12].mxu0 %v910_v14 }
 0x146   :  { %v901_v16 = vpop.f32.mrb[8].mxu0 }
 0x147   :  { %v902_v17 = vadd.f32 %v1348_v15, %v901_v16  ;;  %v1526_v18 = vpop.f32.mrb[9].mxu0 }
 0x148   :  { %v904_v19 = vpop.f32.mrb[10].mxu0 }
 0x149   :  { %v905_v20 = vadd.f32 %v1348_v15, %v904_v19  ;;  %v1527_v21 = vpop.f32.mrb[11].mxu0  ;;  %v908_v22 = vmax.f32 %v902_v17, 0.0 }
 0x14b   :  { %v909_v23 = vmax.f32 %v905_v20, 0.0 }
 0x14d   :  { %v911_v24 = vpack.c.bf16 %v909_v23, %v908_v22 }
 0x14f   :  { %1545 = vmatmul.mubr.bf16.vlgmr.msra.gmra.mrb[8].mxu1 %v911_v24 }
 0x150   :  { %1584 = vmatprep.mubr.msk.bf16.mxu1 %vm1722_vm0, %v1721_v12  ;;  %1569 = vmatpush3.bf16.msra.mxu1 %v1682_v25 }
 0x151   :  { %1570 = vmatprep.subr.bf16.mxu1 %v1721_v12 }
 0x154   :  { %1571 = vmatpush3.bf16.msra.mxu1 %v1683_v26 }
 0x155   :  { %1572 = vmatprep.subr.bf16.mxu1 %v1721_v12 }
 0x158   :  { %1573 = vmatpush3.bf16.msra.mxu1 %v1684_v27 }
 0x159   :  { %1574 = vmatprep.subr.bf16.mxu1 %v1721_v12 }
 0x15c   :  { %1575 = vmatpush3.bf16.msra.mxu1 %v1685_v28 }
 0x15d   :  { %1576 = vmatprep.subr.bf16.mxu1 %v1721_v12 }
 0x160   :  { %1577 = vmatpush3.bf16.msra.mxu1 %v1686_v29 }
 0x161   :  { %1578 = vmatprep.subr.bf16.mxu1 %v1721_v12 }
 0x164   :  { %1579 = vmatpush3.bf16.msra.mxu1 %v1687_v30 }
 0x165   :  { %1580 = vmatprep.subr.bf16.mxu1 %v1721_v12 }
 0x168   :  { %1581 = vmatpush3.bf16.msra.mxu1 %v1688_v31 }
 0x169   :  { %1582 = vmatprep.subr.bf16.mxu1 %v1721_v12 }
 0x16c   :  { %1583 = vmatpush3.bf16.msra.mxu1 %v1689_v32 }
 0x207   :  { %v1115_v33 = vpop.f32.mrb[12].mxu0 }
 0x208   :  { %v1566_v34 = vpop.f32.mrb[13].mxu0 }
 0x209   :  { %v1118_v35 = vpop.f32.mrb[14].mxu0 }
 0x20a   :  { %v1567_v36 = vpop.f32.mrb[15].mxu0 }
 0x222   :  { %v1026_v37 = vpop.f32.mrb[8].mxu1 }
 0x223   :  { %v1116_v39 = vadd.f32 %v1115_v33, %v1026_v37  ;;  %v1546_v40 = vpop.f32.mrb[9].mxu1 }
 0x224   :  { %v1029_v41 = vpop.f32.mrb[10].mxu1 }
 0x225   :  { %v1129_v42 = vadd.f32 %v1374_v38, %v1116_v39  ;;  %v1119_v43 = vadd.f32 %v1118_v35, %v1029_v41  ;;  %v1547_v44 = vpop.f32.mrb[11].mxu1 }
 0x227   :  { %1131 = vst [vmem:[%s1999_s12] sm:$0xff] %v1129_v42  ;;  %v1133_v12 = vmul.f32 %v1129_v42, %v1129_v42  ;;  %v1130_v45 = vadd.f32 %v1374_v38, %v1119_v43 }
 0x229   :  { %v1135_v46 = vmul.f32 %v1133_v12, %v1129_v42  ;;  %1132 = vst [vmem:[%s1999_s12 + $0x8] sm:$0xff] %v1130_v45  ;;  %v1134_v47 = vmul.f32 %v1130_v45, %v1130_v45 }
 0x22b   :  { %v1137_v48 = vmul.f32 0.044715, %v1135_v46  ;;  %v1136_v49 = vmul.f32 %v1134_v47, %v1130_v45 }
 0x22d   :  { %v1139_v50 = vadd.f32 %v1137_v48, %v1129_v42  ;;  %v1138_v51 = vmul.f32 0.044715, %v1136_v49 }
 0x22f   :  { %v1140_v52 = vadd.f32 %v1138_v51, %v1130_v45  ;;  %v1141_v53 = vmul.f32 0.7978846, %v1139_v50 }
 0x231   :  { %v1142_v54 = vmul.f32 0.7978846, %v1140_v52  ;;  %1690 = vtanh.f32 %v1141_v53 }
 0x233   :  { %1692 = vtanh.f32 %v1142_v54 }
 0x23b   :  { %v1691_v55 = vpop.eup %1690 }
 0x23c   :  { %v1145_v56 = vadd.f32 1.0, %v1691_v55 }
 0x23d   :  { %v1693_v57 = vpop.eup %1692 }
 0x23e   :  { %v1146_v58 = vadd.f32 1.0, %v1693_v57  ;;  %v1147_v59 = vmul.f32 0.5, %v1145_v56 }
 0x240   :  { %v1148_v60 = vmul.f32 0.5, %v1146_v58  ;;  %v1149_v61 = vmul.f32 %v1147_v59, %v1129_v42 }
 0x242   :  { %v1150_v62 = vmul.f32 %v1148_v60, %v1130_v45 }
 0x244   :  { %v1151_v63 = vpack.c.bf16 %v1150_v62, %v1149_v61 }
 0x246   :  { %1585 = vmatmul.mubr.bf16.vlgmr.msra.gmra.mrb[12].mxu1 %v1151_v63 }
 0x319   :  { %v1257_v1 = vpop.f32.mrb[12].mxu1 }
 0x31a   :  { %v1258_v2 = vadd.f32 %v1375_v0, %v1257_v1  ;;  %v1586_v3 = vpop.f32.mrb[13].mxu1 }
 0x31b   :  { %v1260_v4 = vpop.f32.mrb[14].mxu1 }
 0x31c   :  { %1264 = vst [vmem:[%s1998_s11] sm:$0xff] %v1258_v2  ;;  %v1261_v5 = vadd.f32 %v1375_v0, %v1260_v4  ;;  %v1587_v6 = vpop.f32.mrb[15].mxu1 }
 0x31e   :  { %1265 = vst [vmem:[%s1998_s11 + $0x8] sm:$0xff] %v1261_v5 }
 0x31f   :  { %1274 = vsyncpa [#allocation3], 1 }

</bundles_post_ra>
